<compile_context>
chip_gen: v7x
topology: tpu7x:2x2x1
jax: 0.10.0
libtpu: 0.0.40
codegen_flags: <defaults>
</compile_context>

<pallas_src>
import jax
import jax.numpy as jnp
import numpy as np
from jax.experimental import pallas as pl
from jax.experimental.pallas import tpu as pltpu


def _round_up(x, m):
    return ((x + m - 1) // m) * m


# ----------------------------- Pallas kernel ------------------------------- #

def _multi_input_kernel(x_ref, w_ref, o_ref):
    # One MXU matmul per batch tile: (TB, Din) @ (Din, Dout) -> (TB, Dout).
    # W is a single full block across the grid -> stays VMEM-resident.
    o_ref[...] = jnp.dot(
        x_ref[...], w_ref[...], preferred_element_type=jnp.float32
    ).astype(o_ref.dtype)


def _pick_batch_tile(batch, din, dout, itemsize,
                     vmem_budget_bytes=32 * 1024 * 1024):
    """Largest batch tile that fits a conservative VMEM budget.

    Budget model: resident W + double-buffered X tile + double-buffered out
    tile.  32 MiB keeps headroom on v7x (64 MiB physical VMEM, 32 MiB scoped
    default) while still allowing 512+ row tiles on all generations.
    """
    w_bytes = din * dout * itemsize
    per_row = 2 * (din + dout) * itemsize          # 2x for double buffering
    avail = max(vmem_budget_bytes - w_bytes, per_row * 8)
    tb = int(avail // per_row)
    tb = max(8, min(tb, 1024))                     # per-step overhead amortized
    tb = (tb // 8) * 8                             # sublane multiple
    tb = min(tb, _round_up(batch, 8))              # don't over-pad tiny batches
    return max(tb, 8)


def _pallas_matmul(x, w, out_dtype=jnp.float32):
    """out = x @ w with the batch axis tiled/pipelined and W VMEM-resident."""
    B, Din = x.shape
    Din_w, Dout = w.shape
    assert Din == Din_w, (Din, Din_w)
    itemsize = max(jnp.dtype(x.dtype).itemsize, jnp.dtype(w.dtype).itemsize)

    tb = _pick_batch_tile(B, Din, Dout, itemsize)
    B_pad = _round_up(B, tb)
    if B_pad != B:
        x = jnp.pad(x, ((0, B_pad - B), (0, 0)))

    cost = pl.CostEstimate(
        flops=2 * B_pad * Din * Dout,
        transcendentals=0,
        bytes_accessed=(B_pad * Din + Din * Dout) * itemsize
        + B_pad * Dout * jnp.dtype(out_dtype).itemsize,
    )

    out = pl.pallas_call(
        _multi_input_kernel,
        out_shape=jax.ShapeDtypeStruct((B_pad, Dout), out_dtype),
        grid_spec=pltpu.PrefetchScalarGridSpec(
            num_scalar_prefetch=0,
            grid=(B_pad // tb,),
            in_specs=[
                pl.BlockSpec((tb, Din), lambda i: (i, 0)),     # streamed X tiles
                pl.BlockSpec((Din, Dout), lambda i: (0, 0)),   # resident W
            ],
            out_specs=pl.BlockSpec((tb, Dout), lambda i: (i, 0)),
        ),
        compiler_params=pltpu.CompilerParams(
            # batch tiles are independent -> megacore-shard on v7x
            dimension_semantics=("parallel",),
        ),
        cost_estimate=cost,
    )(x, w)
    return out[:B]


# --------------------------- Module translation ---------------------------- #

class MultiInputPallas:
    """JAX/Pallas port of imputation_dgm MultiInput."""

    def __init__(self, variable_sizes, min_embedding_size=2,
                 max_embedding_size=50, *, key=None,
                 compute_dtype=jnp.float32):
        self.variable_sizes = list(variable_sizes)
        self.has_categorical = any(s != 1 for s in self.variable_sizes)
        self.compute_dtype = compute_dtype
        self.embeddings = []   # None for continuous, (s_i, e_i) array otherwise
        self.size = 0

        if key is None:
            key = jax.random.PRNGKey(0)

        out_sizes = []
        for s in self.variable_sizes:
            if s == 1:
                self.embeddings.append(None)
                out_sizes.append(1)
                self.size += 1
            else:
                e = max(min_embedding_size, min(max_embedding_size, int(s / 2)))
                key, sub = jax.random.split(key)
                # torch.Tensor(...).normal_() -> standard normal init
                emb = jax.random.normal(sub, (s, e), dtype=jnp.float32)
                self.embeddings.append(emb)
                out_sizes.append(e)
                self.size += e

        if not self.has_categorical:
            return

        # --- static index bookkeeping (trace-time constants) ----------------
        cat_in_cols, cont_in_cols, cat_out_start = [], [], []
        in_start, cat_out = 0, 0
        for s, e in zip(self.variable_sizes, out_sizes):
            if s == 1:
                cont_in_cols.append(in_start)
            else:
                cat_in_cols.extend(range(in_start, in_start + s))
                cat_out_start.append(cat_out)
                cat_out += e
            in_start += s

        self.cat_in_cols = jnp.asarray(cat_in_cols, dtype=jnp.int32)
        self.cont_in_cols = jnp.asarray(cont_in_cols, dtype=jnp.int32)
        self.n_cat_in = len(cat_in_cols)
        self.n_cat_out = cat_out
        self.n_cont = len(cont_in_cols)

        # Output-order permutation over concat([y_cat, x_cont], axis=1).
        perm, cat_i, cont_i = [], 0, 0
        for s, e in zip(self.variable_sizes, out_sizes):
            if s == 1:
                perm.append(self.n_cat_out + cont_i)
                cont_i += 1
            else:
                perm.extend(range(cat_out_start[cat_i],
                                  cat_out_start[cat_i] + e))
                cat_i += 1
        self.out_perm = jnp.asarray(perm, dtype=jnp.int32)

        # --- lane-dense block-diagonal embedding matrix (categorical only) --
        self.din_pad = _round_up(self.n_cat_in, 128)
        self.dout_pad = _round_up(self.n_cat_out, 128)
        W = np.zeros((self.din_pad, self.dout_pad), dtype=np.float32)
        r = c = 0
        for s, emb in zip(self.variable_sizes, self.embeddings):
            if s == 1:
                continue
            e = emb.shape[1]
            W[r:r + s, c:c + e] = np.asarray(emb)
            r += s
            c += e
        self.W = jnp.asarray(W).astype(compute_dtype)

    def __call__(self, inputs, *, use_pallas=None):
        if not self.has_categorical:
            return inputs
        B = inputs.shape[0]

        # Gather categorical columns into one contiguous lane-padded slab.
        x_cat = jnp.take(inputs, self.cat_in_cols, axis=1)
        if self.din_pad != self.n_cat_in:
            x_cat = jnp.pad(x_cat, ((0, 0), (0, self.din_pad - self.n_cat_in)))
        x_cat = x_cat.astype(self.compute_dtype)

        if use_pallas is None:
            # Pallas launch/DMA overhead dominates tiny problems -> let XLA fuse.
            use_pallas = 2 * B * self.din_pad * self.dout_pad >= (1 << 22)

        if use_pallas:
            y_cat = _pallas_matmul(x_cat, self.W, out_dtype=jnp.float32)
        else:
            y_cat = jnp.dot(x_cat, self.W,
                            preferred_element_type=jnp.float32)
        y_cat = y_cat[:, :self.n_cat_out].astype(jnp.float32)

        if self.n_cont:
            # Continuous columns bypass the matmul: exact f32 passthrough.
            x_cont = jnp.take(inputs, self.cont_in_cols, axis=1)
            merged = jnp.concatenate([y_cat, x_cont.astype(jnp.float32)], axis=1)
        else:
            merged = y_cat
        # Single static column permutation restores the variable order.
        return jnp.take(merged, self.out_perm, axis=1)


# ------------------------------ Reference ---------------------------------- #

def multi_input_reference(module, inputs):
    """Pure-JAX reference mirroring the PyTorch forward loop."""
    if not module.has_categorical:
        return inputs
    outputs = []
    start = 0
    for s, emb in zip(module.variable_sizes, module.embeddings):
        end = start + s
        variable = inputs[:, start:end]
        if s == 1:
            outputs.append(variable)
        else:
            outputs.append(jnp.matmul(variable, emb))  # squeeze(1) is a no-op (e >= 2)
        start = end
    return jnp.concatenate(outputs, axis=1)


# --------------------------------- Main ------------------------------------ #

if __name__ == "__main__":
    # Small, forward-implied shapes: mixed continuous (size 1) and
    # categorical (size > 1) variables.
    variable_sizes = [1, 4, 1, 6]            # total input features = 12
    batch = 8

    module = MultiInputPallas(variable_sizes, key=jax.random.PRNGKey(0))

    key = jax.random.PRNGKey(0)
    k_cont, k_cat4, k_cat6 = jax.random.split(key, 3)

    # Build an input consistent with the module: continuous columns are
    # arbitrary reals, categorical blocks are one-hot rows.
    total_in = sum(variable_sizes)
    x = jnp.zeros((batch, total_in), dtype=jnp.float32)
    cont_vals = jax.random.normal(k_cont, (batch, 2), dtype=jnp.float32)
    x = x.at[:, 0].set(cont_vals[:, 0])       # variable 0 (size 1)
    x = x.at[:, 5].set(cont_vals[:, 1])       # variable 2 (size 1)
    idx4 = jax.random.randint(k_cat4, (batch,), 0, 4)
    idx6 = jax.random.randint(k_cat6, (batch,), 0, 6)
    x = x.at[:, 1:5].set(jax.nn.one_hot(idx4, 4, dtype=jnp.float32))
    x = x.at[:, 6:12].set(jax.nn.one_hot(idx6, 6, dtype=jnp.float32))

    # Force the Pallas path (the size heuristic would route this toy problem
    # to plain jnp.dot, per the perf review).
    out = module(x, use_pallas=True)
    out = jax.block_until_ready(out)

    ref = multi_input_reference(module, x)
    assert out.shape == (batch, module.size), (out.shape, module.size)
    assert jnp.allclose(out, ref, atol=1e-5, rtol=1e-5), "mismatch vs reference"

    print("KERNEL_OK")
</pallas_src>

<mosaic_0001>
module attributes {stable_mosaic.version = 11 : i64} {
  func.func @_multi_input_kernel(%arg0: i32, %arg1: memref<8x128xf32, #tpu.memory_space<vmem>>, %arg2: memref<128x128xf32, #tpu.memory_space<vmem>>, %arg3: memref<8x128xf32, #tpu.memory_space<vmem>>) attributes {dimension_semantics = [#tpu.dimension_semantics<parallel>], iteration_bounds = array<i64: 1>, scalar_prefetch = 0 : i64, scratch_operands = 0 : i64, tpu.core_type = #tpu.core_type<tc>, window_params = [{transform_indices = @transform_0, window_bounds = array<i64: 8, 128>}, {pipeline_mode = #tpu.pipeline_mode<synchronous>, transform_indices = @transform_1, window_bounds = array<i64: 128, 128>}, {transform_indices = @transform_2, window_bounds = array<i64: 8, 128>}]} {
    %c0 = arith.constant 0 : index
    %c0_0 = arith.constant 0 : index
    %0 = vector.load %arg1[%c0, %c0_0] : memref<8x128xf32, #tpu.memory_space<vmem>>, vector<8x128xf32>
    %c0_1 = arith.constant 0 : index
    %c0_2 = arith.constant 0 : index
    %1 = vector.load %arg2[%c0_1, %c0_2] : memref<128x128xf32, #tpu.memory_space<vmem>>, vector<128x128xf32>
    %cst = arith.constant dense<0.000000e+00> : vector<8x128xf32>
    %2 = tpu.matmul %0, %1, %cst {dimension_numbers = #tpu.dot_dimension_numbers<[1], [0], [0], [1], [0, 0, 1, 1], [], []>} : vector<8x128xf32>, vector<128x128xf32>, vector<8x128xf32> -> vector<8x128xf32>
    %c0_3 = arith.constant 0 : index
    %c0_4 = arith.constant 0 : index
    %3 = vector.load %arg3[%c0_3, %c0_4] : memref<8x128xf32, #tpu.memory_space<vmem>>, vector<8x128xf32>
    tpu.vector_store %arg3[%c0_3, %c0_4], %2 {strides = array<i32>} : memref<8x128xf32, #tpu.memory_space<vmem>>, vector<8x128xf32>,
    return
  }
  func.func @transform_0(%arg0: i32) -> (i32, i32) {
    %c0_i32 = arith.constant 0 : i32
    %c0_i32_0 = arith.constant 0 : i32
    return %arg0, %c0_i32 : i32, i32
  }
  func.func @transform_1(%arg0: i32) -> (i32, i32) {
    %c0_i32 = arith.constant 0 : i32
    %c0_i32_0 = arith.constant 0 : i32
    %c0_i32_1 = arith.constant 0 : i32
    return %c0_i32, %c0_i32_0 : i32, i32
  }
  func.func @transform_2(%arg0: i32) -> (i32, i32) {
    %c0_i32 = arith.constant 0 : i32
    %c0_i32_0 = arith.constant 0 : i32
    return %arg0, %c0_i32 : i32, i32
  }
}

</mosaic_0001>

<bundles_post_ra>
// kernel: tpu_custom_call.1
= control target key start
LH: loop header
LB: loop body
LE: loop exit
PB: predicated region body
PF: predicated region fallthrough
CT: control target
= control target key end

     0   :  { %7 = vsyncpa [#allocation3], 0  ;;  %s364_s0 = inlined_call_operand.hbm [shape: f32[8,128], index: 0, kind: input, shape index: {}]   ;;  %s365_s1 = inlined_call_operand.hbm [shape: f32[128,128], index: 1, kind: input, shape index: {}]   ;;  %s366_s2 = inlined_call_operand.hbm [shape: f32[8,128], index: 2, kind: output, shape index: {}]  }
   0x1   :  { %8 = vsyncpa [#allocation6], 0 }
   0x2   :  { %9 = vsyncpa [#allocation4], 0  ;;  %s298_s9 = smov [#allocation2]   ;;  %s299_s11 = smov [#allocation5]  }
   0x3   :  { %s16_s10 = sshll.u32 %s298_s9, 4  ;;  %s25_s12 = sshll.u32 %s299_s11, 4  ;;  %s17_s10 = int_to_ptr.vmem [resolvable:$true] %s16_s10  ;;  %s321_s12 = int_to_ptr.vmem [resolvable:$true] %s25_s12 }
   0x4   :  { %s226_s15 = scalar_lea.hbm %s364_s0, 128 }
   0x5   :  { %p227_p0 = scmp.ne.s32.totalorder %s364_s0, %s226_s15  ;;  %p230_p1 = scmp.lt.u32.totalorder %s226_s15, %s364_s0 }
   0x7   :  { %p232_p2 = pnand %p230_p1, %p227_p0 }
   0x9   :  { %235 = shalt.err (!%p232_p2)
}
   0xa   :  { %s236_s20 = scalar_lea.vmem %s17_s10, 128  ;;  %p241_p4 = scmp.lt.s32.totalorder %s17_s10, %s17_s10 }
   0xb   :  { %p237_p3 = scmp.ne.s32.totalorder %s17_s10, %s236_s20  ;;  %p242_p5 = scmp.lt.s32.totalorder %s236_s20, %s236_s20 }
   0xd   :  { %p243_p6 = por %p242_p5, %p241_p4 }
   0xf   :  { %p244_p7 = pnand %p243_p6, %p237_p3 }
  0x11   :  { %247 = shalt.err (!%p244_p7)
}
  0x12   :  { %19 = dma.hbm_to_vmem [thread:$0]  %s364_s0, 128, %s17_s10, [#allocation3]  }
  0x13   :  { %s248_s25 = scalar_lea.hbm %s365_s1, 2048 }
  0x14   :  { %p249_p8 = scmp.ne.s32.totalorder %s365_s1, %s248_s25  ;;  %p252_p9 = scmp.lt.u32.totalorder %s248_s25, %s365_s1 }
  0x16   :  { %p254_p10 = pnand %p252_p9, %p249_p8 }
  0x18   :  { %257 = shalt.err (!%p254_p10)
}
  0x19   :  { %s258_s30 = scalar_lea.vmem %s321_s12, 2048  ;;  %p263_p12 = scmp.lt.s32.totalorder %s321_s12, %s321_s12 }
  0x1a   :  { %p259_p11 = scmp.ne.s32.totalorder %s321_s12, %s258_s30  ;;  %p264_p13 = scmp.lt.s32.totalorder %s258_s30, %s258_s30 }
  0x1c   :  { %p265_p0 = por %p264_p13, %p263_p12 }
  0x1e   :  { %p266_p1 = pnand %p265_p0, %p259_p11 }
  0x20   :  { %269 = shalt.err (!%p266_p1)
}
  0x21   :  { %s300_s0 = smov 128   ;;  %s301_s3 = smov 8  }
  0x22   :  { %31 = dma.hbm_to_vmem [thread:$0]  %s365_s1, 2048, %s321_s12, [#allocation6], %s300_s0, %s300_s0, %s301_s3  }
  0x23   :  { %292 = dma.done.wait [#allocation3], 128  }
  0x24   :  { %293 = vsyncadd [#allocation3], 4294967168 }
  0x25   :  { %294 = dma.done.wait [#allocation6], 2048  }
  0x26   :  { %295 = vsyncadd [#allocation6], 4294965248  ;;  %v302_v0 = vmov 0.0|0.0   ;;  %vm303_vm0 = vmmov 0   ;;  %v304_v1 = vmov 0.0   ;;  %v39_v2 = vld [vmem:[#allocation5] sm:$0xff] }
  0x27   :  { %194 = vmatprep.subr.bf16.mxu0 %v302_v0  ;;  %191 = vmatprep.mubr.msk.f32.mxu0 %vm303_vm0, %v304_v1  ;;  %v40_v3 = vld [vmem:[#allocation5 + $0x8] sm:$0xff]  ;;  %v41_v4 = vld [vmem:[#allocation5 + $0x10] sm:$0xff]  ;;  %v42_v6 = vld [vmem:[#allocation5 + $0x18] sm:$0xff]  ;;  %s305_s1 = smov [#allocation7]  }
  0x28   :  { %v195_v5 = vpack.c.bf16 %v40_v3, %v39_v2  ;;  %v198_v7 = vpack.c.bf16 %v42_v6, %v41_v4  ;;  %v43_v8 = vld [vmem:[#allocation5 + $0x20] sm:$0xff]  ;;  %v44_v9 = vld [vmem:[#allocation5 + $0x28] sm:$0xff]  ;;  %v45_v11 = vld [vmem:[#allocation5 + $0x30] sm:$0xff]  ;;  %s132_s6 = sshll.u32 %s305_s1, 4  ;;  %s133_s6 = int_to_ptr.vmem [resolvable:$true] %s132_s6 }
  0x29   :  { %v201_v10 = vpack.c.bf16 %v44_v9, %v43_v8  ;;  %v46_v12 = vld [vmem:[#allocation5 + $0x38] sm:$0xff]  ;;  %v47_v14 = vld [vmem:[#allocation5 + $0x40] sm:$0xff]  ;;  %v48_v15 = vld [vmem:[#allocation5 + $0x48] sm:$0xff]  ;;  %s270_s7 = scalar_lea.vmem %s133_s6, 128  ;;  %p275_p3 = scmp.lt.s32.totalorder %s133_s6, %s133_s6 }
  0x2a   :  { %196 = vmatpush3.bf16.msra.mxu0 %v195_v5  ;;  %v204_v13 = vpack.c.bf16 %v46_v12, %v45_v11  ;;  %v207_v16 = vpack.c.bf16 %v48_v15, %v47_v14  ;;  %v49_v17 = vld [vmem:[#allocation5 + $0x50] sm:$0xff]  ;;  %v50_v18 = vld [vmem:[#allocation5 + $0x58] sm:$0xff]  ;;  %v51_v20 = vld [vmem:[#allocation5 + $0x60] sm:$0xff]  ;;  %p271_p2 = scmp.ne.s32.totalorder %s133_s6, %s270_s7  ;;  %p276_p4 = scmp.lt.s32.totalorder %s270_s7, %s270_s7 }
  0x2b   :  { %197 = vmatprep.subr.bf16.mxu0 %v302_v0  ;;  %v210_v19 = vpack.c.bf16 %v50_v18, %v49_v17  ;;  %v52_v21 = vld [vmem:[#allocation5 + $0x68] sm:$0xff]  ;;  %v53_v23 = vld [vmem:[#allocation5 + $0x70] sm:$0xff]  ;;  %v54_v24 = vld [vmem:[#allocation5 + $0x78] sm:$0xff] }
  0x2c   :  { %v213_v22 = vpack.c.bf16 %v52_v21, %v51_v20  ;;  %v216_v25 = vpack.c.bf16 %v54_v24, %v53_v23  ;;  %v38_v26 = vld [vmem:[#allocation2] sm:$0xff]  ;;  %p277_p5 = por %p276_p4, %p275_p3 }
  0x2e   :  { %199 = vmatpush3.bf16.msra.mxu0 %v198_v7  ;;  %p278_p6 = pnand %p277_p5, %p271_p2 }
  0x2f   :  { %200 = vmatprep.subr.bf16.mxu0 %v302_v0 }
  0x32   :  { %202 = vmatpush3.bf16.msra.mxu0 %v201_v10 }
  0x33   :  { %203 = vmatprep.subr.bf16.mxu0 %v302_v0 }
  0x36   :  { %205 = vmatpush3.bf16.msra.mxu0 %v204_v13 }
  0x37   :  { %206 = vmatprep.subr.bf16.mxu0 %v302_v0 }
  0x3a   :  { %208 = vmatpush3.bf16.msra.mxu0 %v207_v16 }
  0x3b   :  { %209 = vmatprep.subr.bf16.mxu0 %v302_v0 }
  0x3e   :  { %211 = vmatpush3.bf16.msra.mxu0 %v210_v19 }
  0x3f   :  { %212 = vmatprep.subr.bf16.mxu0 %v302_v0 }
  0x42   :  { %214 = vmatpush3.bf16.msra.mxu0 %v213_v22 }
  0x43   :  { %215 = vmatprep.subr.bf16.mxu0 %v302_v0 }
  0x46   :  { %217 = vmatpush3.bf16.msra.mxu0 %v216_v25 }
  0x49   :  { %192 = vmatmul.mubr.f32.vlgmr.msra.gmra.mrb[0].mxu0 %v38_v26 }
 0x11c   :  { %v121_v27 = vpop.f32.mrb[0].mxu0 }
 0x11d   :  { %125 = vst [vmem:[#allocation7] sm:$0xff] %v121_v27  ;;  %v193_v28 = vpop.f32.mrb[1].mxu0 }
 0x11e   :  { %281 = shalt.err (!%p278_p6)
}
 0x11f   :  { %s282_s10 = scalar_lea.hbm %s366_s2, 128 }
 0x120   :  { %p283_p7 = scmp.ne.s32.totalorder %s366_s2, %s282_s10  ;;  %p286_p8 = scmp.lt.u32.totalorder %s282_s10, %s366_s2 }
 0x122   :  { %p288_p9 = pnand %p286_p8, %p283_p7 }
 0x124   :  { %291 = shalt.err (!%p288_p9)
}
 0x125   :  { %135 = dma.vmem_to_hbm [thread:$0]  %s133_s6, 128, %s366_s2, [#allocation4]  }
 0x126   :  { %296 = dma.done.wait [#allocation4], 128  }
 0x127   :  { %297 = vsyncadd [#allocation4], 4294967168 }
 0x128   :  { %139 = vsyncpa [#allocation3], 1 }
 0x129   :  { %140 = vsyncpa [#allocation6], 1 }
 0x12a   :  { %141 = vsyncpa [#allocation4], 1 }

</bundles_post_ra>
